<compile_context>
chip_gen: v5e
topology: v5e:2x2
jax: 0.10.0
libtpu: 0.0.40
codegen_flags: <defaults>
</compile_context>

<pallas_src>
import functools

import jax
import jax.numpy as jnp
from jax.experimental import pallas as pl
from jax.experimental.pallas import tpu as pltpu


def _packed_ensemble_kernel(x_ref, w1_ref, b1_ref, wh_ref, bh_ref, wo_ref,
                            bo_ref, mu_ref, std_ref, *, n_hidden, num_models):
    """One grid step = one batch tile, whole ensemble (lane-packed)."""
    x = x_ref[...].astype(jnp.float32)                        # (TB, D)

    # Layer 1: concatenated member weights -> (TB, M*H), one MXU pass.
    h = jnp.maximum(
        jnp.dot(x, w1_ref[...], preferred_element_type=jnp.float32)
        + b1_ref[...], 0.0)

    # Hidden layers: block-diagonal (M*H, M*H) matmuls.  n_hidden is a small
    # compile-time constant, so a static unroll keeps the LLO scheduler happy.
    for l in range(n_hidden):
        h = jnp.maximum(
            jnp.dot(h, wh_ref[l], preferred_element_type=jnp.float32)
            + bh_ref[l], 0.0)

    # Block-diagonal output head -> per-model predictions, lane-dense (TB, M).
    preds = (jnp.dot(h, wo_ref[...], preferred_element_type=jnp.float32)
             + bo_ref[...])

    # Mean + unbiased std over the model (lane) axis, centered formulation.
    mu = jnp.mean(preds, axis=-1, keepdims=True)              # (TB, 1)
    centered = preds - mu
    # num_models == 1 yields 0/0 = nan, matching torch.std(correction=1).
    var = jnp.sum(centered * centered, axis=-1, keepdims=True) / jnp.float32(
        num_models - 1)
    mu_ref[...] = mu
    std_ref[...] = jnp.sqrt(var)


def pack_ensemble_params(params):
    """Repack stacked per-model params into lane-packed / block-diag form."""
    w1, b1, wh, bh, wo, bo = params
    M, D, H = w1.shape
    n_hidden = wh.shape[1]
    MH = M * H
    eye = jnp.eye(M, dtype=w1.dtype)

    # Layer 1: concatenate member weight columns -> (D, M*H).
    w1p = jnp.transpose(w1, (1, 0, 2)).reshape(D, MH)
    b1p = b1.reshape(1, MH)

    # Hidden layers: block-diagonal (n_hidden, M*H, M*H).
    # whp[l, m*H+i, n*H+j] = wh[m, l, i, j] if m == n else 0
    whp = jnp.einsum("mn,mlij->lminj", eye, wh).reshape(n_hidden, MH, MH)
    bhp = jnp.transpose(bh, (1, 0, 2)).reshape(n_hidden, 1, MH)

    # Output head: block-diagonal (M*H, M); column m holds wo[m] in its block.
    wop = (eye[:, None, :] * wo).reshape(MH, M)               # wo is (M, H, 1)
    bop = bo.reshape(1, M)
    return w1p, b1p, whp, bhp, wop, bop


@functools.partial(jax.jit, static_argnames=("n_hidden",))
def torch_ensemble_forward(x, params, *, n_hidden):
    """Pallas equivalent of TorchEnsemble.forward (explain_mode=False)."""
    w1, _, _, _, _, _ = params
    M, D, H = w1.shape
    B = x.shape[0]
    MH = M * H

    # One-time weight repack; fused into the same compiled graph as the call.
    w1p, b1p, whp, bhp, wop, bop = pack_ensemble_params(params)

    # Batch tile: whole batch if small (full-dim block always legal), else
    # 256-row tiles (multiple of 8 sublanes).
    TB = B if B <= 256 else 256
    grid = (pl.cdiv(B, TB),)

    kernel = functools.partial(_packed_ensemble_kernel,
                               n_hidden=n_hidden, num_models=M)

    mu, std = pl.pallas_call(
        kernel,
        out_shape=(jax.ShapeDtypeStruct((B, 1), jnp.float32),
                   jax.ShapeDtypeStruct((B, 1), jnp.float32)),
        grid_spec=pltpu.PrefetchScalarGridSpec(
            num_scalar_prefetch=0,
            grid=grid,
            in_specs=[
                pl.BlockSpec((TB, D), lambda b: (b, 0)),               # x
                pl.BlockSpec((D, MH), lambda b: (0, 0)),               # w1 packed
                pl.BlockSpec((1, MH), lambda b: (0, 0)),               # b1 packed
                pl.BlockSpec((n_hidden, MH, MH), lambda b: (0, 0, 0)),  # wh block-diag
                pl.BlockSpec((n_hidden, 1, MH), lambda b: (0, 0, 0)),   # bh packed
                pl.BlockSpec((MH, M), lambda b: (0, 0)),               # wo block-diag
                pl.BlockSpec((1, M), lambda b: (0, 0)),                # bo packed
            ],
            out_specs=[
                pl.BlockSpec((TB, 1), lambda b: (b, 0)),               # mu
                pl.BlockSpec((TB, 1), lambda b: (b, 0)),               # std
            ],
            scratch_shapes=[]),
        compiler_params=pltpu.CompilerParams(
            dimension_semantics=("parallel",)),   # batch tiles are independent
    )(x, w1p, b1p, whp, bhp, wop, bop)
    return mu, std


def init_ensemble_params(key, num_models, input_dim, hidden_dim, n_hidden):
    """Deterministic synthetic parameters for the stacked ensemble."""
    k1, k2, k3, k4, k5, k6 = jax.random.split(key, 6)
    s_in = 1.0 / jnp.sqrt(jnp.float32(input_dim))
    s_h = 1.0 / jnp.sqrt(jnp.float32(hidden_dim))
    w1 = jax.random.normal(k1, (num_models, input_dim, hidden_dim), jnp.float32) * s_in
    b1 = jax.random.normal(k2, (num_models, hidden_dim), jnp.float32) * 0.1
    wh = jax.random.normal(k3, (num_models, n_hidden, hidden_dim, hidden_dim), jnp.float32) * s_h
    bh = jax.random.normal(k4, (num_models, n_hidden, hidden_dim), jnp.float32) * 0.1
    wo = jax.random.normal(k5, (num_models, hidden_dim, 1), jnp.float32) * s_h
    bo = jax.random.normal(k6, (num_models, 1), jnp.float32) * 0.1
    return w1, b1, wh, bh, wo, bo


def _reference_forward(x, params):
    """Pure-JAX reference (mirrors the torch semantics incl. unbiased std)."""
    w1, b1, wh, bh, wo, bo = params
    n_hidden = wh.shape[1]

    def one_model(m):
        h = jnp.maximum(x @ w1[m] + b1[m][None, :], 0.0)
        for l in range(n_hidden):
            h = jnp.maximum(h @ wh[m, l] + bh[m, l][None, :], 0.0)
        return h @ wo[m] + bo[m][None, :]

    preds = jnp.stack([one_model(m) for m in range(w1.shape[0])], axis=-1)
    mu = preds.mean(axis=-1)
    std = preds.std(axis=-1, ddof=1)
    return mu, std


if __name__ == "__main__":
    # Small shapes implied by the module: (batch, input_dim) MLP input.
    # num_models * hidden_dim = 128 -> exactly one full lane tile.
    batch, input_dim, hidden_dim, n_hidden, num_models = 8, 16, 32, 2, 4

    key = jax.random.PRNGKey(0)
    kx, kp = jax.random.split(key)
    x = jax.random.normal(kx, (batch, input_dim), jnp.float32)
    params = init_ensemble_params(kp, num_models, input_dim, hidden_dim, n_hidden)

    mu, std = torch_ensemble_forward(x, params, n_hidden=n_hidden)
    jax.block_until_ready((mu, std))

    mu_ref, std_ref = _reference_forward(x, params)
    assert mu.shape == (batch, 1) and std.shape == (batch, 1)
    assert jnp.allclose(mu, mu_ref, atol=1e-4, rtol=1e-4)
    assert jnp.allclose(std, std_ref, atol=1e-4, rtol=1e-4)

    print("KERNEL_OK")
</pallas_src>

<mosaic_0001>
module attributes {stable_mosaic.version = 11 : i64} {
  func.func @_packed_ensemble_kernel(%arg0: i32, %arg1: memref<8x16xf32, #tpu.memory_space<vmem>>, %arg2: memref<16x128xf32, #tpu.memory_space<vmem>>, %arg3: memref<1x128xf32, #tpu.memory_space<vmem>>, %arg4: memref<2x128x128xf32, #tpu.memory_space<vmem>>, %arg5: memref<2x1x128xf32, #tpu.memory_space<vmem>>, %arg6: memref<128x4xf32, #tpu.memory_space<vmem>>, %arg7: memref<1x4xf32, #tpu.memory_space<vmem>>, %arg8: memref<8x1xf32, #tpu.memory_space<vmem>>, %arg9: memref<8x1xf32, #tpu.memory_space<vmem>>) attributes {dimension_semantics = [#tpu.dimension_semantics<parallel>], iteration_bounds = array<i64: 1>, scalar_prefetch = 0 : i64, scratch_operands = 0 : i64, tpu.core_type = #tpu.core_type<tc>, window_params = [{transform_indices = @transform_0, window_bounds = array<i64: 8, 16>}, {pipeline_mode = #tpu.pipeline_mode<synchronous>, transform_indices = @transform_1, window_bounds = array<i64: 16, 128>}, {pipeline_mode = #tpu.pipeline_mode<synchronous>, transform_indices = @transform_2, window_bounds = array<i64: 1, 128>}, {pipeline_mode = #tpu.pipeline_mode<synchronous>, transform_indices = @transform_3, window_bounds = array<i64: 2, 128, 128>}, {pipeline_mode = #tpu.pipeline_mode<synchronous>, transform_indices = @transform_4, window_bounds = array<i64: 2, 1, 128>}, {pipeline_mode = #tpu.pipeline_mode<synchronous>, transform_indices = @transform_5, window_bounds = array<i64: 128, 4>}, {pipeline_mode = #tpu.pipeline_mode<synchronous>, transform_indices = @transform_6, window_bounds = array<i64: 1, 4>}, {transform_indices = @transform_7, window_bounds = array<i64: 8, 1>}, {transform_indices = @transform_8, window_bounds = array<i64: 8, 1>}]} {
    %c0 = arith.constant 0 : index
    %c0_0 = arith.constant 0 : index
    %0 = vector.load %arg1[%c0, %c0_0] : memref<8x16xf32, #tpu.memory_space<vmem>>, vector<8x16xf32>
    %c0_1 = arith.constant 0 : index
    %c0_2 = arith.constant 0 : index
    %1 = vector.load %arg2[%c0_1, %c0_2] : memref<16x128xf32, #tpu.memory_space<vmem>>, vector<16x128xf32>
    %cst = arith.constant dense<0.000000e+00> : vector<8x128xf32>
    %2 = tpu.matmul %0, %1, %cst {dimension_numbers = #tpu.dot_dimension_numbers<[1], [0], [0], [1], [0, 0, 1, 1], [], []>} : vector<8x16xf32>, vector<16x128xf32>, vector<8x128xf32> -> vector<8x128xf32>
    %c0_3 = arith.constant 0 : index
    %c0_4 = arith.constant 0 : index
    %3 = vector.load %arg3[%c0_3, %c0_4] : memref<1x128xf32, #tpu.memory_space<vmem>>, vector<1x128xf32>
    %4 = vector.broadcast %3 : vector<1x128xf32> to vector<8x128xf32>
    %5 = arith.addf %2, %4 : vector<8x128xf32>
    %cst_5 = arith.constant 0.000000e+00 : f32
    %6 = vector.broadcast %cst_5 : f32 to vector<8x128xf32>
    %7 = arith.maximumf %5, %6 : vector<8x128xf32>
    %c0_6 = arith.constant 0 : index
    %c0_7 = arith.constant 0 : index
    %c0_8 = arith.constant 0 : index
    %8 = vector.load %arg4[%c0_6, %c0_7, %c0_8] : memref<2x128x128xf32, #tpu.memory_space<vmem>>, vector<1x128x128xf32>
    %9 = vector.shape_cast %8 : vector<1x128x128xf32> to vector<128x128xf32>
    %cst_9 = arith.constant dense<0.000000e+00> : vector<8x128xf32>
    %10 = tpu.matmul %7, %9, %cst_9 {dimension_numbers = #tpu.dot_dimension_numbers<[1], [0], [0], [1], [0, 0, 1, 1], [], []>} : vector<8x128xf32>, vector<128x128xf32>, vector<8x128xf32> -> vector<8x128xf32>
    %c0_10 = arith.constant 0 : index
    %c0_11 = arith.constant 0 : index
    %c0_12 = arith.constant 0 : index
    %11 = vector.load %arg5[%c0_10, %c0_11, %c0_12] : memref<2x1x128xf32, #tpu.memory_space<vmem>>, vector<1x1x128xf32>
    %12 = vector.shape_cast %11 : vector<1x1x128xf32> to vector<1x128xf32>
    %13 = vector.broadcast %12 : vector<1x128xf32> to vector<8x128xf32>
    %14 = arith.addf %10, %13 : vector<8x128xf32>
    %cst_13 = arith.constant 0.000000e+00 : f32
    %15 = vector.broadcast %cst_13 : f32 to vector<8x128xf32>
    %16 = arith.maximumf %14, %15 : vector<8x128xf32>
    %c1 = arith.constant 1 : index
    %c0_14 = arith.constant 0 : index
    %c0_15 = arith.constant 0 : index
    %17 = vector.load %arg4[%c1, %c0_14, %c0_15] : memref<2x128x128xf32, #tpu.memory_space<vmem>>, vector<1x128x128xf32>
    %18 = vector.shape_cast %17 : vector<1x128x128xf32> to vector<128x128xf32>
    %cst_16 = arith.constant dense<0.000000e+00> : vector<8x128xf32>
    %19 = tpu.matmul %16, %18, %cst_16 {dimension_numbers = #tpu.dot_dimension_numbers<[1], [0], [0], [1], [0, 0, 1, 1], [], []>} : vector<8x128xf32>, vector<128x128xf32>, vector<8x128xf32> -> vector<8x128xf32>
    %c1_17 = arith.constant 1 : index
    %c0_18 = arith.constant 0 : index
    %c0_19 = arith.constant 0 : index
    %20 = vector.load %arg5[%c1_17, %c0_18, %c0_19] : memref<2x1x128xf32, #tpu.memory_space<vmem>>, vector<1x1x128xf32>
    %21 = vector.shape_cast %20 : vector<1x1x128xf32> to vector<1x128xf32>
    %22 = vector.broadcast %21 : vector<1x128xf32> to vector<8x128xf32>
    %23 = arith.addf %19, %22 : vector<8x128xf32>
    %cst_20 = arith.constant 0.000000e+00 : f32
    %24 = vector.broadcast %cst_20 : f32 to vector<8x128xf32>
    %25 = arith.maximumf %23, %24 : vector<8x128xf32>
    %c0_21 = arith.constant 0 : index
    %c0_22 = arith.constant 0 : index
    %26 = vector.load %arg6[%c0_21, %c0_22] : memref<128x4xf32, #tpu.memory_space<vmem>>, vector<128x4xf32>
    %cst_23 = arith.constant dense<0.000000e+00> : vector<8x4xf32>
    %27 = tpu.matmul %25, %26, %cst_23 {dimension_numbers = #tpu.dot_dimension_numbers<[1], [0], [0], [1], [0, 0, 1, 1], [], []>} : vector<8x128xf32>, vector<128x4xf32>, vector<8x4xf32> -> vector<8x4xf32>
    %c0_24 = arith.constant 0 : index
    %c0_25 = arith.constant 0 : index
    %28 = vector.load %arg7[%c0_24, %c0_25] : memref<1x4xf32, #tpu.memory_space<vmem>>, vector<1x4xf32>
    %29 = vector.broadcast %28 : vector<1x4xf32> to vector<8x4xf32>
    %30 = arith.addf %27, %29 : vector<8x4xf32>
    %cst_26 = arith.constant dense<0.000000e+00> : vector<8xf32>
    %31 = vector.multi_reduction <add>, %30, %cst_26 [1] : vector<8x4xf32> to vector<8xf32>
    %32 = vector.shape_cast %31 : vector<8xf32> to vector<8x1xf32>
    %cst_27 = arith.constant 4.000000e+00 : f32
    %33 = vector.broadcast %cst_27 : f32 to vector<8x1xf32>
    %34 = arith.divf %32, %33 : vector<8x1xf32>
    %35 = vector.broadcast %34 : vector<8x1xf32> to vector<8x4xf32>
    %36 = arith.subf %30, %35 : vector<8x4xf32>
    %37 = arith.mulf %36, %36 : vector<8x4xf32>
    %cst_28 = arith.constant dense<0.000000e+00> : vector<8xf32>
    %38 = vector.multi_reduction <add>, %37, %cst_28 [1] : vector<8x4xf32> to vector<8xf32>
    %39 = vector.shape_cast %38 : vector<8xf32> to vector<8x1xf32>
    %cst_29 = arith.constant 3.000000e+00 : f32
    %40 = vector.broadcast %cst_29 : f32 to vector<8x1xf32>
    %41 = arith.divf %39, %40 : vector<8x1xf32>
    %c0_30 = arith.constant 0 : index
    %c0_31 = arith.constant 0 : index
    %42 = vector.load %arg8[%c0_30, %c0_31] : memref<8x1xf32, #tpu.memory_space<vmem>>, vector<8x1xf32>
    tpu.vector_store %arg8[%c0_30, %c0_31], %34 {strides = array<i32>} : memref<8x1xf32, #tpu.memory_space<vmem>>, vector<8x1xf32>,
    %43 = math.sqrt %41 : vector<8x1xf32>
    %c0_32 = arith.constant 0 : index
    %c0_33 = arith.constant 0 : index
    %44 = vector.load %arg9[%c0_32, %c0_33] : memref<8x1xf32, #tpu.memory_space<vmem>>, vector<8x1xf32>
    tpu.vector_store %arg9[%c0_32, %c0_33], %43 {strides = array<i32>} : memref<8x1xf32, #tpu.memory_space<vmem>>, vector<8x1xf32>,
    return
  }
  func.func @transform_0(%arg0: i32) -> (i32, i32) {
    %c0_i32 = arith.constant 0 : i32
    %c0_i32_0 = arith.constant 0 : i32
    return %arg0, %c0_i32 : i32, i32
  }
  func.func @transform_1(%arg0: i32) -> (i32, i32) {
    %c0_i32 = arith.constant 0 : i32
    %c0_i32_0 = arith.constant 0 : i32
    %c0_i32_1 = arith.constant 0 : i32
    return %c0_i32, %c0_i32_0 : i32, i32
  }
  func.func @transform_2(%arg0: i32) -> (i32, i32) {
    %c0_i32 = arith.constant 0 : i32
    %c0_i32_0 = arith.constant 0 : i32
    %c0_i32_1 = arith.constant 0 : i32
    return %c0_i32, %c0_i32_0 : i32, i32
  }
  func.func @transform_3(%arg0: i32) -> (i32, i32, i32) {
    %c0_i32 = arith.constant 0 : i32
    %c0_i32_0 = arith.constant 0 : i32
    %c0_i32_1 = arith.constant 0 : i32
    %c0_i32_2 = arith.constant 0 : i32
    return %c0_i32, %c0_i32_0, %c0_i32_1 : i32, i32, i32
  }
  func.func @transform_4(%arg0: i32) -> (i32, i32, i32) {
    %c0_i32 = arith.constant 0 : i32
    %c0_i32_0 = arith.constant 0 : i32
    %c0_i32_1 = arith.constant 0 : i32
    %c0_i32_2 = arith.constant 0 : i32
    return %c0_i32, %c0_i32_0, %c0_i32_1 : i32, i32, i32
  }
  func.func @transform_5(%arg0: i32) -> (i32, i32) {
    %c0_i32 = arith.constant 0 : i32
    %c0_i32_0 = arith.constant 0 : i32
    %c0_i32_1 = arith.constant 0 : i32
    return %c0_i32, %c0_i32_0 : i32, i32
  }
  func.func @transform_6(%arg0: i32) -> (i32, i32) {
    %c0_i32 = arith.constant 0 : i32
    %c0_i32_0 = arith.constant 0 : i32
    %c0_i32_1 = arith.constant 0 : i32
    return %c0_i32, %c0_i32_0 : i32, i32
  }
  func.func @transform_7(%arg0: i32) -> (i32, i32) {
    %c0_i32 = arith.constant 0 : i32
    %c0_i32_0 = arith.constant 0 : i32
    return %arg0, %c0_i32 : i32, i32
  }
  func.func @transform_8(%arg0: i32) -> (i32, i32) {
    %c0_i32 = arith.constant 0 : i32
    %c0_i32_0 = arith.constant 0 : i32
    return %arg0, %c0_i32 : i32, i32
  }
}

</mosaic_0001>

<bundles_post_ra>
// kernel: torch_ensemble_forward.1
= control target key start
LH: loop header
LB: loop body
LE: loop exit
PB: predicated region body
PF: predicated region fallthrough
CT: control target
= control target key end

     0   :  { %vm35_vm0 = vcmask 130048   ;;  %vm184_vm1 = vcmask 31744   ;;  %vm209_vm3 = vcmask 7168   ;;  %s484_s1 = inlined_call_operand.vmem [shape: f32[16,128], index: 1, kind: input, shape index: {}]   ;;  %s485_s0 = inlined_call_operand.vmem [shape: f32[8,16], index: 0, kind: input, shape index: {}]   ;;  %s486_s3 = inlined_call_operand.vmem [shape: f32[2,128,128], index: 3, kind: input, shape index: {}]   ;;  %s487_s2 = inlined_call_operand.vmem [shape: f32[1,128], index: 2, kind: input, shape index: {}]   ;;  %s488_s4 = inlined_call_operand.vmem [shape: f32[2,1,128], index: 4, kind: input, shape index: {}]   ;;  %s489_s5 = inlined_call_operand.vmem [shape: f32[128,4], index: 5, kind: input, shape index: {}]   ;;  %s490_s6 = inlined_call_operand.vmem [shape: f32[1,4], index: 6, kind: input, shape index: {}]   ;;  %s491_s7 = inlined_call_operand.vmem [shape: f32[8,1], index: 7, kind: output, shape index: {0}]   ;;  %s492_s8 = inlined_call_operand.vmem [shape: f32[8,1], index: 8, kind: output, shape index: {1}]  }
   0x1   :  { %v30_v0 = vld [vmem:[%s484_s1 + $0x8] sm:$0xff]  ;;  %v29_v1 = vld [vmem:[%s484_s1] sm:$0xff]  ;;  %v75_v3 = vld [vmem:[%s486_s3 + $0x78] sm:$0xff] }
   0x2   :  { %53 = vmatpush.msra.mxu0 %v30_v0  ;;  %v28_v2 = vld [vmem:[%s485_s0] sm:$0xff]  ;;  %v74_v4 = vld [vmem:[%s486_s3 + $0x70] sm:$0xff]  ;;  %80 = vmatpush.msra.mxu1 %v75_v3  ;;  %v73_v5 = vld [vmem:[%s486_s3 + $0x68] sm:$0xff]  ;;  %v262_v3 = vmov 4.0  }
   0x3   :  { %v72_v6 = vld [vmem:[%s486_s3 + $0x60] sm:$0xff]  ;;  %v71_v7 = vld [vmem:[%s486_s3 + $0x58] sm:$0xff]  ;;  %v70_v8 = vld [vmem:[%s486_s3 + $0x50] sm:$0xff]  ;;  %256 = vrcp.f32 %v262_v3 }
   0x4   :  { %54 = vmatpush.msra.mxu0 %v29_v1  ;;  %81 = vmatpush.msra.mxu1 %v74_v4  ;;  %v69_v9 = vld [vmem:[%s486_s3 + $0x48] sm:$0xff]  ;;  %v68_v10 = vld [vmem:[%s486_s3 + $0x40] sm:$0xff]  ;;  %v67_v11 = vld [vmem:[%s486_s3 + $0x38] sm:$0xff] }
   0x5   :  { %232 = vmatmul.msk.f32.vlgmr.msra.gmra.mxu0 %vm35_vm0, %v28_v2  ;;  %v66_v12 = vld [vmem:[%s486_s3 + $0x30] sm:$0xff]  ;;  %v65_v13 = vld [vmem:[%s486_s3 + $0x28] sm:$0xff]  ;;  %v64_v14 = vld [vmem:[%s486_s3 + $0x20] sm:$0xff] }
   0x6   :  { %82 = vmatpush.msra.mxu1 %v73_v5  ;;  %v63_v15 = vld [vmem:[%s486_s3 + $0x18] sm:$0xff]  ;;  %v62_v16 = vld [vmem:[%s486_s3 + $0x10] sm:$0xff]  ;;  %v61_v17 = vld [vmem:[%s486_s3 + $0x8] sm:$0xff] }
   0x7   :  { %v60_v18 = vld [vmem:[%s486_s3] sm:$0xff]  ;;  %v248_v19 = vld [vmem:[%s486_s3 + $0xf8] sm:$0xff]  ;;  %v247_v20 = vld [vmem:[%s486_s3 + $0xf0] sm:$0xff] }
   0x8   :  { %83 = vmatpush.msra.mxu1 %v72_v6  ;;  %123 = vmatpush.msra.mxu2 %v248_v19  ;;  %v246_v21 = vld [vmem:[%s486_s3 + $0xe8] sm:$0xff]  ;;  %v245_v22 = vld [vmem:[%s486_s3 + $0xe0] sm:$0xff]  ;;  %v244_v23 = vld [vmem:[%s486_s3 + $0xd8] sm:$0xff] }
   0x9   :  { %v243_v24 = vld [vmem:[%s486_s3 + $0xd0] sm:$0xff]  ;;  %v242_v25 = vld [vmem:[%s486_s3 + $0xc8] sm:$0xff]  ;;  %v241_v26 = vld [vmem:[%s486_s3 + $0xc0] sm:$0xff]  ;;  %v257_v4 = vpop.eup %256 }
   0xa   :  { %84 = vmatpush.msra.mxu1 %v71_v7  ;;  %124 = vmatpush.msra.mxu2 %v247_v20  ;;  %v240_v27 = vld [vmem:[%s486_s3 + $0xb8] sm:$0xff]  ;;  %v239_v28 = vld [vmem:[%s486_s3 + $0xb0] sm:$0xff]  ;;  %v238_v29 = vld [vmem:[%s486_s3 + $0xa8] sm:$0xff]  ;;  %v189_v5 = vmul.f32 4.0, %v257_v4  ;;  %vm193_vm2 = vweird.f32 %v257_v4 }
   0xb   :  { %v237_v30 = vld [vmem:[%s486_s3 + $0xa0] sm:$0xff]  ;;  %v236_v31 = vld [vmem:[%s486_s3 + $0x98] sm:$0xff]  ;;  %v235_v36 = vld [vmem:[%s486_s3 + $0x90] sm:$0xff] }
   0xc   :  { %85 = vmatpush.msra.mxu1 %v70_v8  ;;  %125 = vmatpush.msra.mxu2 %v246_v21  ;;  %v252_v32 = vld [vmem:[%s487_s2] ss:$0 sm:$0xff]  ;;  %v234_v37 = vld [vmem:[%s486_s3 + $0x88] sm:$0xff]  ;;  %v159_v39 = vld [vmem:[%s489_s5 + $0x78] sm:$0xff]  ;;  %v190_v6 = vsub.f32 1.0, %v189_v5 }
   0xd   :  { %v233_v38 = vld [vmem:[%s486_s3 + $0x80] sm:$0xff]  ;;  %v158_v40 = vld [vmem:[%s489_s5 + $0x70] sm:$0xff]  ;;  %164 = vmatpush.msra.mxu3 %v159_v39  ;;  %v157_v41 = vld [vmem:[%s489_s5 + $0x68] sm:$0xff] }
   0xe   :  { %86 = vmatpush.msra.mxu1 %v69_v9  ;;  %126 = vmatpush.msra.mxu2 %v245_v22  ;;  %v156_v42 = vld [vmem:[%s489_s5 + $0x60] sm:$0xff]  ;;  %v155_v43 = vld [vmem:[%s489_s5 + $0x58] sm:$0xff]  ;;  %v154_v44 = vld [vmem:[%s489_s5 + $0x50] sm:$0xff]  ;;  %v191_v7 = vmul.f32 %v257_v4, %v190_v6 }
   0xf   :  { %165 = vmatpush.msra.mxu3 %v158_v40  ;;  %v153_v45 = vld [vmem:[%s489_s5 + $0x48] sm:$0xff]  ;;  %v152_v46 = vld [vmem:[%s489_s5 + $0x40] sm:$0xff]  ;;  %v151_v47 = vld [vmem:[%s489_s5 + $0x38] sm:$0xff] }
  0x10   :  { %87 = vmatpush.msra.mxu1 %v68_v10  ;;  %127 = vmatpush.msra.mxu2 %v244_v23  ;;  %v150_v48 = vld [vmem:[%s489_s5 + $0x30] sm:$0xff]  ;;  %v149_v49 = vld [vmem:[%s489_s5 + $0x28] sm:$0xff]  ;;  %v148_v50 = vld [vmem:[%s489_s5 + $0x20] sm:$0xff]  ;;  %v192_v8 = vadd.f32 %v257_v4, %v191_v7 }
  0x11   :  { %166 = vmatpush.msra.mxu3 %v157_v41  ;;  %v147_v51 = vld [vmem:[%s489_s5 + $0x18] sm:$0xff]  ;;  %v253_v52 = vld [vmem:[%s488_s4] ss:$0 sm:$0xff]  ;;  %v146_v56 = vld [vmem:[%s489_s5 + $0x10] sm:$0xff] }
  0x12   :  { %88 = vmatpush.msra.mxu1 %v67_v11  ;;  %128 = vmatpush.msra.mxu2 %v243_v24  ;;  %v145_v57 = vld [vmem:[%s489_s5 + $0x8] sm:$0xff]  ;;  %v144_v58 = vld [vmem:[%s489_s5] sm:$0xff]  ;;  %v194_v9 = vsel %vm193_vm2, %v257_v4, %v192_v8 }
  0x13   :  { %167 = vmatpush.msra.mxu3 %v156_v42  ;;  %v254_v59 = vld [vmem:[%s488_s4 + $0x1] ss:$0 sm:$0xff]  ;;  %v255_v63 = vld [vmem:[%s490_s6] ss:$0 sm:$0xff] }
  0x14   :  { %89 = vmatpush.msra.mxu1 %v66_v12  ;;  %129 = vmatpush.msra.mxu2 %v242_v25 }
  0x15   :  { %168 = vmatpush.msra.mxu3 %v155_v43 }
  0x16   :  { %90 = vmatpush.msra.mxu1 %v65_v13  ;;  %130 = vmatpush.msra.mxu2 %v241_v26 }
  0x17   :  { %169 = vmatpush.msra.mxu3 %v154_v44 }
  0x18   :  { %91 = vmatpush.msra.mxu1 %v64_v14  ;;  %131 = vmatpush.msra.mxu2 %v240_v27 }
  0x19   :  { %170 = vmatpush.msra.mxu3 %v153_v45 }
  0x1a   :  { %92 = vmatpush.msra.mxu1 %v63_v15  ;;  %132 = vmatpush.msra.mxu2 %v239_v28  ;;  %v263_v15 = vmov 3.0  }
  0x1b   :  { %171 = vmatpush.msra.mxu3 %v152_v46  ;;  %258 = vrcp.f32 %v263_v15 }
  0x1c   :  { %93 = vmatpush.msra.mxu1 %v62_v16  ;;  %133 = vmatpush.msra.mxu2 %v238_v29 }
  0x1d   :  { %172 = vmatpush.msra.mxu3 %v151_v47 }
  0x1e   :  { %94 = vmatpush.msra.mxu1 %v61_v17  ;;  %134 = vmatpush.msra.mxu2 %v237_v30 }
  0x1f   :  { %173 = vmatpush.msra.mxu3 %v150_v48 }
  0x20   :  { %95 = vmatpush.msra.mxu1 %v60_v18  ;;  %135 = vmatpush.msra.mxu2 %v236_v31 }
  0x21   :  { %174 = vmatpush.msra.mxu3 %v149_v49  ;;  %v259_v16 = vpop.eup %258 }
  0x22   :  { %136 = vmatpush.msra.mxu2 %v235_v36  ;;  %v202_v17 = vmul.f32 3.0, %v259_v16  ;;  %vm206_vm4 = vweird.f32 %v259_v16 }
  0x23   :  { %175 = vmatpush.msra.mxu3 %v148_v50 }
  0x24   :  { %137 = vmatpush.msra.mxu2 %v234_v37  ;;  %v203_v18 = vsub.f32 1.0, %v202_v17 }
  0x25   :  { %176 = vmatpush.msra.mxu3 %v147_v51 }
  0x26   :  { %138 = vmatpush.msra.mxu2 %v233_v38  ;;  %v204_v19 = vmul.f32 %v259_v16, %v203_v18 }
  0x27   :  { %177 = vmatpush.msra.mxu3 %v146_v56 }
  0x28   :  { %v205_v20 = vadd.f32 %v259_v16, %v204_v19 }
  0x29   :  { %178 = vmatpush.msra.mxu3 %v145_v57 }
  0x2a   :  { %v207_v21 = vsel %vm206_vm4, %v259_v16, %v205_v20 }
  0x2b   :  { %179 = vmatpush.msra.mxu3 %v144_v58 }
  0x82   :  { %v56_v33 = vpop.f32.mrf.mxu0 }
  0x83   :  { %v57_v34 = vadd.f32 %v252_v32, %v56_v33 }
  0x85   :  { %v59_v35 = vmax.f32 %v57_v34, 0.0 }
  0x87   :  { %96 = vmatmul.f32.vlgmr.msra.gmra.mxu1 %v59_v35 }
 0x104   :  { %v97_v53 = vpop.f32.mrf.mxu1 }
 0x105   :  { %v98_v54 = vadd.f32 %v253_v52, %v97_v53 }
 0x107   :  { %v100_v55 = vmax.f32 %v98_v54, 0.0 }
 0x109   :  { %139 = vmatmul.f32.vlgmr.msra.gmra.mxu2 %v100_v55 }
 0x18c   :  { %v140_v60 = vpop.f32.mrf.mxu2 }
 0x18d   :  { %v141_v61 = vadd.f32 %v254_v59, %v140_v60 }
 0x18f   :  { %v143_v62 = vmax.f32 %v141_v61, 0.0 }
 0x191   :  { %180 = vmatmul.f32.vlgmr.msra.gmra.mxu3 %v143_v62 }
 0x214   :  { %v181_v0 = vpop.f32.mrf.mxu3 }
 0x215   :  { %v182_v1 = vadd.f32 %v255_v63, %v181_v0 }
 0x217   :  { %v185_v2 = vsel %vm184_vm1, %v182_v1, 0.0 }
 0x218   :  { %186 = vadd.xlane.f32.xlu0 %v185_v2 }
 0x28b   :  { %v187_v10 = vpop.xlane.xlu0 %186 }
 0x28c   :  { %v195_v11 = vmul.f32 %v194_v9, %v187_v10 }
 0x28e   :  { %v196_v12 = vsub.f32 %v182_v1, %v195_v11  ;;  %210 = vst.msk [vmem:[%s491_s7] sm:$0xff] %vm209_vm3, %v195_v11 }
 0x290   :  { %v197_v13 = vmul.f32 %v196_v12, %v196_v12 }
 0x292   :  { %v198_v14 = vsel %vm184_vm1, %v197_v13, 0.0 }
 0x293   :  { %199 = vadd.xlane.f32.xlu0 %v198_v14 }
 0x306   :  { %v200_v22 = vpop.xlane.xlu0 %199 }
 0x307   :  { %v208_v23 = vmul.f32 %v207_v21, %v200_v22 }
 0x309   :  { %260 = vrsqrt.f32 %v208_v23  ;;  %vm218_vm5 = vcmp.eq.f32.partialorder %v208_v23, inf  ;;  %v221_v31 = vand.u32 2147483648, %v208_v23  ;;  %vm220_vm6 = vcmp.eq.f32.partialorder %v208_v23, 0.0 }
 0x30f   :  { %v261_v24 = vpop.eup %260 }
 0x310   :  { %v212_v25 = vmul.f32 %v261_v24, %v208_v23 }
 0x312   :  { %v213_v26 = vmul.f32 %v261_v24, %v212_v25 }
 0x314   :  { %v214_v27 = vmul.f32 0.5, %v213_v26 }
 0x316   :  { %v215_v28 = vsub.f32 1.5, %v214_v27 }
 0x318   :  { %v216_v29 = vmul.f32 %v261_v24, %v215_v28 }
 0x31a   :  { %v217_v30 = vmul.f32 %v216_v29, %v208_v23 }
 0x31c   :  { %v219_v32 = vsel %vm218_vm5, %v208_v23, %v217_v30 }
 0x31d   :  { %v222_v33 = vsel %vm220_vm6, %v221_v31, %v219_v32 }
 0x31e   :  { %223 = vst.msk [vmem:[%s492_s8] sm:$0xff] %vm209_vm3, %v222_v33 }

</bundles_post_ra>
